<compile_context>
chip_gen: v5e
topology: v5e:2x2
jax: 0.10.0
libtpu: 0.0.40
codegen_flags: <defaults>
</compile_context>

<pallas_src>
import functools

import jax
import jax.numpy as jnp
from jax import lax
from jax.experimental import pallas as pl
from jax.experimental.pallas import tpu as pltpu

_LANE = 128
_SUBLANE = 8


def _round_up(x, m):
    return (x + m - 1) // m * m


# ----------------------------------------------------------------------------
# Fused kernel: 2-layer MLP (+ optional final ReLU, per-segment LayerNorm)
# ----------------------------------------------------------------------------
def _fused_mlp_kernel(seg_ref, norm_ref, inv_fout_ref,          # scalar prefetch (SMEM)
                      x_ref, w1_ref, b1_ref, w2_ref, b2_ref, g_ref, bt_ref,
                      o_ref, *, activate_final: bool, eps: float = 1e-5):
    t = pl.program_id(0)
    ln_flag = norm_ref[t]          # 1.0 -> LayerNorm, 0.0 -> identity
    inv_fout = inv_fout_ref[t]     # 1 / (real output width of this segment)

    # ---- Linear 1 (bf16 MXU pass, f32 accumulation) + ReLU ------------------
    x = x_ref[...].astype(jnp.bfloat16)                       # (tile, Fin_pad)
    h = jnp.dot(x, w1_ref[0], preferred_element_type=jnp.float32)
    h = jnp.maximum(h + b1_ref[0], 0.0)                       # (tile, L_pad) f32

    # ---- Linear 2 -----------------------------------------------------------
    y = jnp.dot(h.astype(jnp.bfloat16), w2_ref[0],
                preferred_element_type=jnp.float32)
    y = y + b2_ref[0]                                         # (tile, Fout_pad) f32
    if activate_final:
        y = jnp.maximum(y, 0.0)

    # ---- LayerNorm over the real channels (single pass) ---------------------
    # Padded output lanes are exactly zero (W2/b2 zero-padded), so full-width
    # sums equal sums over the real channels; divide by the real f_out.
    s1 = jnp.sum(y, axis=-1, keepdims=True)
    s2 = jnp.sum(y * y, axis=-1, keepdims=True)
    mean = s1 * inv_fout
    var = s2 * inv_fout - mean * mean
    y_ln = (y - mean) * lax.rsqrt(var + eps) * g_ref[0] + bt_ref[0]

    out = ln_flag * y_ln + (1.0 - ln_flag) * y                # per-segment select
    o_ref[...] = out.astype(o_ref.dtype)


# ----------------------------------------------------------------------------
# GraphNetworkIndependentBlock forward — single fused pallas_call
# ----------------------------------------------------------------------------
def graph_network_independent_block(data, edge_params, node_params,
                                    global_params, *, activate_final=True,
                                    normalize=True, max_tile_rows=512):
    """data: dict with 'edge_attr' [E,Fe], 'x' [N,Fn], 'u' [G,Fg]."""
    segments = [
        (data["edge_attr"], edge_params, normalize),   # edge model
        (data["x"],         node_params, normalize),   # node model
        (data["u"],         global_params, False),     # global model: no LayerNorm
    ]

    latent = edge_params[0].shape[1]
    assert all(p[0].shape[1] == latent for _, p, _ in segments), \
        "all three MLPs share latent_size in the reference module"

    f_in_pad = _round_up(max(x.shape[1] for x, _, _ in segments), _LANE)
    f_out_pad = _round_up(max(p[2].shape[1] for _, p, _ in segments), _LANE)
    latent_pad = _round_up(latent, _LANE)

    # One tile covers the largest segment at small sizes; caps at max_tile_rows
    # so large graphs still pipeline and megacore-shard over row tiles.
    tile_rows = min(max_tile_rows,
                    _round_up(max(x.shape[0] for x, _, _ in segments), _SUBLANE))

    x_blocks, w1s, b1s, w2s, b2s, gs, bts = [], [], [], [], [], [], []
    seg_ids, norm_flags, inv_fouts = [], [], []
    seg_row_offsets, seg_rows = [], []
    row_off = 0
    for s, (x, params, do_norm) in enumerate(segments):
        w1, b1, w2, b2, g, bt = params
        n_rows, f_in = x.shape
        f_out = w2.shape[1]
        rows_pad = _round_up(max(n_rows, 1), tile_rows)
        n_tiles = rows_pad // tile_rows

        x_blocks.append(jnp.zeros((rows_pad, f_in_pad), jnp.float32)
                        .at[:n_rows, :f_in].set(x.astype(jnp.float32)))
        w1s.append(jnp.zeros((f_in_pad, latent_pad), jnp.bfloat16)
                   .at[:f_in, :latent].set(w1.astype(jnp.bfloat16)))
        b1s.append(jnp.zeros((1, latent_pad), jnp.float32)
                   .at[:, :latent].set(b1.astype(jnp.float32)))
        w2s.append(jnp.zeros((latent_pad, f_out_pad), jnp.bfloat16)
                   .at[:latent, :f_out].set(w2.astype(jnp.bfloat16)))
        b2s.append(jnp.zeros((1, f_out_pad), jnp.float32)
                   .at[:, :f_out].set(b2.astype(jnp.float32)))
        gs.append(jnp.zeros((1, f_out_pad), jnp.float32)
                  .at[:, :f_out].set(g.astype(jnp.float32)))
        bts.append(jnp.zeros((1, f_out_pad), jnp.float32)
                   .at[:, :f_out].set(bt.astype(jnp.float32)))

        seg_ids += [s] * n_tiles
        norm_flags += [1.0 if do_norm else 0.0] * n_tiles
        inv_fouts += [1.0 / float(f_out)] * n_tiles
        seg_row_offsets.append(row_off)
        seg_rows.append(n_rows)
        row_off += rows_pad

    x_cat = jnp.concatenate(x_blocks, axis=0)          # (R_total_pad, Fin_pad)
    w1_all = jnp.stack(w1s)                            # (3, Fin_pad, L_pad) bf16
    b1_all = jnp.stack(b1s)                            # (3, 1, L_pad)       f32
    w2_all = jnp.stack(w2s)                            # (3, L_pad, Fout_pad) bf16
    b2_all = jnp.stack(b2s)                            # (3, 1, Fout_pad)    f32
    g_all = jnp.stack(gs)
    bt_all = jnp.stack(bts)

    seg_arr = jnp.asarray(seg_ids, jnp.int32)          # per-tile weight-set id
    norm_arr = jnp.asarray(norm_flags, jnp.float32)    # per-tile LayerNorm flag
    inv_fout_arr = jnp.asarray(inv_fouts, jnp.float32) # per-tile 1/f_out
    num_tiles = int(seg_arr.shape[0])
    total_rows = int(x_cat.shape[0])

    kernel = functools.partial(_fused_mlp_kernel, activate_final=activate_final)

    out_pad = pl.pallas_call(
        kernel,
        out_shape=jax.ShapeDtypeStruct((total_rows, f_out_pad), jnp.float32),
        grid_spec=pltpu.PrefetchScalarGridSpec(
            num_scalar_prefetch=3,
            grid=(num_tiles,),
            in_specs=[
                # concatenated, lane-padded activations: block i of the row axis
                pl.BlockSpec((tile_rows, f_in_pad),
                             lambda i, seg, nrm, fo: (i, 0)),
                # per-segment weights selected via scalar-prefetched segment id
                pl.BlockSpec((1, f_in_pad, latent_pad),
                             lambda i, seg, nrm, fo: (seg[i], 0, 0)),
                pl.BlockSpec((1, 1, latent_pad),
                             lambda i, seg, nrm, fo: (seg[i], 0, 0)),
                pl.BlockSpec((1, latent_pad, f_out_pad),
                             lambda i, seg, nrm, fo: (seg[i], 0, 0)),
                pl.BlockSpec((1, 1, f_out_pad),
                             lambda i, seg, nrm, fo: (seg[i], 0, 0)),
                pl.BlockSpec((1, 1, f_out_pad),
                             lambda i, seg, nrm, fo: (seg[i], 0, 0)),
                pl.BlockSpec((1, 1, f_out_pad),
                             lambda i, seg, nrm, fo: (seg[i], 0, 0)),
            ],
            out_specs=pl.BlockSpec((tile_rows, f_out_pad),
                                   lambda i, seg, nrm, fo: (i, 0)),
        ),
        compiler_params=pltpu.CompilerParams(
            dimension_semantics=("parallel",)),        # row tiles are independent
    )(seg_arr, norm_arr, inv_fout_arr,
      x_cat, w1_all, b1_all, w2_all, b2_all, g_all, bt_all)

    # Unpack: slice each segment back out of the padded, concatenated output.
    outs = []
    for (x, params, _), off, n_rows in zip(segments, seg_row_offsets, seg_rows):
        f_out = params[2].shape[1]
        outs.append(out_pad[off:off + n_rows, :f_out])

    return {"edge_attr": outs[0], "x": outs[1], "u": outs[2],
            "edge_index": data.get("edge_index")}


# ----------------------------------------------------------------------------
# Deterministic parameter construction (PyTorch-Linear-style uniform fan-in)
# ----------------------------------------------------------------------------
def _init_mlp_params(key, f_in, latent, f_out):
    k1, k2, k3, k4 = jax.random.split(key, 4)
    lim1 = 1.0 / jnp.sqrt(f_in)
    lim2 = 1.0 / jnp.sqrt(latent)
    w1 = jax.random.uniform(k1, (f_in, latent), jnp.float32, -lim1, lim1)
    b1 = jax.random.uniform(k2, (1, latent), jnp.float32, -lim1, lim1)
    w2 = jax.random.uniform(k3, (latent, f_out), jnp.float32, -lim2, lim2)
    b2 = jax.random.uniform(k4, (1, f_out), jnp.float32, -lim2, lim2)
    gamma = jnp.ones((1, f_out), jnp.float32)   # LayerNorm weight
    beta = jnp.zeros((1, f_out), jnp.float32)   # LayerNorm bias
    return (w1, b1, w2, b2, gamma, beta)


# ----------------------------------------------------------------------------
# Pure-JAX reference (same bf16-matmul / f32-accumulate math as the kernel)
# ----------------------------------------------------------------------------
def _mlp_ref(x, params, activate_final, normalize, eps=1e-5):
    w1, b1, w2, b2, g, bt = params
    h = jnp.dot(x.astype(jnp.bfloat16), w1.astype(jnp.bfloat16),
                preferred_element_type=jnp.float32) + b1
    h = jnp.maximum(h, 0.0)
    y = jnp.dot(h.astype(jnp.bfloat16), w2.astype(jnp.bfloat16),
                preferred_element_type=jnp.float32) + b2
    if activate_final:
        y = jnp.maximum(y, 0.0)
    if normalize:
        m = jnp.mean(y, axis=-1, keepdims=True)
        v = jnp.mean(y * y, axis=-1, keepdims=True) - m * m
        y = (y - m) * lax.rsqrt(v + eps) * g + bt
    return y


if __name__ == "__main__":
    key = jax.random.PRNGKey(0)

    # Small problem sizes consistent with the module's forward.
    n_edges, n_nodes, n_graphs = 32, 16, 2
    n_edge_feat_in, n_edge_feat_out = 4, 8
    n_node_feat_in, n_node_feat_out = 6, 8
    n_global_feat_in, n_global_feat_out = 3, 8
    latent_size = 128   # module default

    k_e, k_n, k_g, k_de, k_dn, k_dg = jax.random.split(key, 6)

    edge_params = _init_mlp_params(k_e, n_edge_feat_in, latent_size, n_edge_feat_out)
    node_params = _init_mlp_params(k_n, n_node_feat_in, latent_size, n_node_feat_out)
    global_params = _init_mlp_params(k_g, n_global_feat_in, latent_size,
                                     n_global_feat_out)

    data = {
        "edge_attr": jax.random.normal(k_de, (n_edges, n_edge_feat_in), jnp.float32),
        "x":         jax.random.normal(k_dn, (n_nodes, n_node_feat_in), jnp.float32),
        "u":         jax.random.normal(k_dg, (n_graphs, n_global_feat_in), jnp.float32),
        "edge_index": None,
    }

    out = graph_network_independent_block(
        data, edge_params, node_params, global_params,
        activate_final=True, normalize=True)
    jax.block_until_ready(out["edge_attr"])
    jax.block_until_ready(out["x"])
    jax.block_until_ready(out["u"])

    # Check against pure-JAX reference (identical bf16/f32 math).
    ref_e = _mlp_ref(data["edge_attr"], edge_params, True, True)
    ref_n = _mlp_ref(data["x"], node_params, True, True)
    ref_g = _mlp_ref(data["u"], global_params, True, False)
    assert out["edge_attr"].shape == (n_edges, n_edge_feat_out)
    assert out["x"].shape == (n_nodes, n_node_feat_out)
    assert out["u"].shape == (n_graphs, n_global_feat_out)
    assert jnp.allclose(out["edge_attr"], ref_e, atol=2e-3, rtol=2e-3)
    assert jnp.allclose(out["x"], ref_n, atol=2e-3, rtol=2e-3)
    assert jnp.allclose(out["u"], ref_g, atol=2e-3, rtol=2e-3)

    print("KERNEL_OK")
</pallas_src>

<mosaic_0001>
module attributes {stable_mosaic.version = 11 : i64} {
  func.func @_fused_mlp_kernel(%arg0: i32, %arg1: memref<3xi32, #tpu.memory_space<smem>>, %arg2: memref<3xf32, #tpu.memory_space<smem>>, %arg3: memref<3xf32, #tpu.memory_space<smem>>, %arg4: memref<32x128xf32, #tpu.memory_space<vmem>>, %arg5: memref<1x128x128xbf16, #tpu.memory_space<vmem>>, %arg6: memref<1x1x128xf32, #tpu.memory_space<vmem>>, %arg7: memref<1x128x128xbf16, #tpu.memory_space<vmem>>, %arg8: memref<1x1x128xf32, #tpu.memory_space<vmem>>, %arg9: memref<1x1x128xf32, #tpu.memory_space<vmem>>, %arg10: memref<1x1x128xf32, #tpu.memory_space<vmem>>, %arg11: memref<32x128xf32, #tpu.memory_space<vmem>>) attributes {dimension_semantics = [#tpu.dimension_semantics<parallel>], iteration_bounds = array<i64: 3>, scalar_prefetch = 3 : i64, scratch_operands = 0 : i64, tpu.core_type = #tpu.core_type<tc>, window_params = [{transform_indices = @transform_0, window_bounds = array<i64: 32, 128>}, {transform_indices = @transform_1, window_bounds = array<i64: 1, 128, 128>}, {transform_indices = @transform_2, window_bounds = array<i64: 1, 1, 128>}, {transform_indices = @transform_3, window_bounds = array<i64: 1, 128, 128>}, {transform_indices = @transform_4, window_bounds = array<i64: 1, 1, 128>}, {transform_indices = @transform_5, window_bounds = array<i64: 1, 1, 128>}, {transform_indices = @transform_6, window_bounds = array<i64: 1, 1, 128>}, {transform_indices = @transform_7, window_bounds = array<i64: 32, 128>}]} {
    %0 = arith.index_cast %arg0 : i32 to index
    %1 = memref.load %arg2[%0] : memref<3xf32, #tpu.memory_space<smem>>
    %2 = arith.index_cast %arg0 : i32 to index
    %3 = memref.load %arg3[%2] : memref<3xf32, #tpu.memory_space<smem>>
    %c0 = arith.constant 0 : index
    %c0_0 = arith.constant 0 : index
    %4 = vector.load %arg4[%c0, %c0_0] : memref<32x128xf32, #tpu.memory_space<vmem>>, vector<32x128xf32>
    %5 = arith.truncf %4 : vector<32x128xf32> to vector<32x128xbf16>
    %c0_1 = arith.constant 0 : index
    %c0_2 = arith.constant 0 : index
    %c0_3 = arith.constant 0 : index
    %6 = vector.load %arg5[%c0_1, %c0_2, %c0_3] : memref<1x128x128xbf16, #tpu.memory_space<vmem>>, vector<1x128x128xbf16>
    %7 = vector.shape_cast %6 : vector<1x128x128xbf16> to vector<128x128xbf16>
    %cst = arith.constant dense<0.000000e+00> : vector<32x128xf32>
    %8 = tpu.matmul %5, %7, %cst {dimension_numbers = #tpu.dot_dimension_numbers<[1], [0], [0], [1], [0, 0, 1, 1], [], []>} : vector<32x128xbf16>, vector<128x128xbf16>, vector<32x128xf32> -> vector<32x128xf32>
    %c0_4 = arith.constant 0 : index
    %c0_5 = arith.constant 0 : index
    %c0_6 = arith.constant 0 : index
    %9 = vector.load %arg6[%c0_4, %c0_5, %c0_6] : memref<1x1x128xf32, #tpu.memory_space<vmem>>, vector<1x1x128xf32>
    %10 = vector.shape_cast %9 : vector<1x1x128xf32> to vector<1x128xf32>
    %11 = vector.broadcast %10 : vector<1x128xf32> to vector<32x128xf32>
    %12 = arith.addf %8, %11 : vector<32x128xf32>
    %cst_7 = arith.constant 0.000000e+00 : f32
    %13 = vector.broadcast %cst_7 : f32 to vector<32x128xf32>
    %14 = arith.maximumf %12, %13 : vector<32x128xf32>
    %15 = arith.truncf %14 : vector<32x128xf32> to vector<32x128xbf16>
    %c0_8 = arith.constant 0 : index
    %c0_9 = arith.constant 0 : index
    %c0_10 = arith.constant 0 : index
    %16 = vector.load %arg7[%c0_8, %c0_9, %c0_10] : memref<1x128x128xbf16, #tpu.memory_space<vmem>>, vector<1x128x128xbf16>
    %17 = vector.shape_cast %16 : vector<1x128x128xbf16> to vector<128x128xbf16>
    %cst_11 = arith.constant dense<0.000000e+00> : vector<32x128xf32>
    %18 = tpu.matmul %15, %17, %cst_11 {dimension_numbers = #tpu.dot_dimension_numbers<[1], [0], [0], [1], [0, 0, 1, 1], [], []>} : vector<32x128xbf16>, vector<128x128xbf16>, vector<32x128xf32> -> vector<32x128xf32>
    %c0_12 = arith.constant 0 : index
    %c0_13 = arith.constant 0 : index
    %c0_14 = arith.constant 0 : index
    %19 = vector.load %arg8[%c0_12, %c0_13, %c0_14] : memref<1x1x128xf32, #tpu.memory_space<vmem>>, vector<1x1x128xf32>
    %20 = vector.shape_cast %19 : vector<1x1x128xf32> to vector<1x128xf32>
    %21 = vector.broadcast %20 : vector<1x128xf32> to vector<32x128xf32>
    %22 = arith.addf %18, %21 : vector<32x128xf32>
    %cst_15 = arith.constant 0.000000e+00 : f32
    %23 = vector.broadcast %cst_15 : f32 to vector<32x128xf32>
    %24 = arith.maximumf %22, %23 : vector<32x128xf32>
    %cst_16 = arith.constant dense<0.000000e+00> : vector<32xf32>
    %25 = vector.multi_reduction <add>, %24, %cst_16 [1] : vector<32x128xf32> to vector<32xf32>
    %26 = vector.shape_cast %25 : vector<32xf32> to vector<32x1xf32>
    %27 = arith.mulf %24, %24 : vector<32x128xf32>
    %cst_17 = arith.constant dense<0.000000e+00> : vector<32xf32>
    %28 = vector.multi_reduction <add>, %27, %cst_17 [1] : vector<32x128xf32> to vector<32xf32>
    %29 = vector.shape_cast %28 : vector<32xf32> to vector<32x1xf32>
    %30 = vector.broadcast %3 : f32 to vector<32x1xf32>
    %31 = arith.mulf %26, %30 : vector<32x1xf32>
    %32 = vector.broadcast %3 : f32 to vector<32x1xf32>
    %33 = arith.mulf %29, %32 : vector<32x1xf32>
    %34 = arith.mulf %31, %31 : vector<32x1xf32>
    %35 = arith.subf %33, %34 : vector<32x1xf32>
    %36 = vector.broadcast %31 : vector<32x1xf32> to vector<32x128xf32>
    %37 = arith.subf %24, %36 : vector<32x128xf32>
    %cst_18 = arith.constant 9.99999974E-6 : f32
    %38 = vector.broadcast %cst_18 : f32 to vector<32x1xf32>
    %39 = arith.addf %35, %38 : vector<32x1xf32>
    %40 = math.rsqrt %39 : vector<32x1xf32>
    %41 = vector.broadcast %40 : vector<32x1xf32> to vector<32x128xf32>
    %42 = arith.mulf %37, %41 : vector<32x128xf32>
    %c0_19 = arith.constant 0 : index
    %c0_20 = arith.constant 0 : index
    %c0_21 = arith.constant 0 : index
    %43 = vector.load %arg9[%c0_19, %c0_20, %c0_21] : memref<1x1x128xf32, #tpu.memory_space<vmem>>, vector<1x1x128xf32>
    %44 = vector.shape_cast %43 : vector<1x1x128xf32> to vector<1x128xf32>
    %45 = vector.broadcast %44 : vector<1x128xf32> to vector<32x128xf32>
    %46 = arith.mulf %42, %45 : vector<32x128xf32>
    %c0_22 = arith.constant 0 : index
    %c0_23 = arith.constant 0 : index
    %c0_24 = arith.constant 0 : index
    %47 = vector.load %arg10[%c0_22, %c0_23, %c0_24] : memref<1x1x128xf32, #tpu.memory_space<vmem>>, vector<1x1x128xf32>
    %48 = vector.shape_cast %47 : vector<1x1x128xf32> to vector<1x128xf32>
    %49 = vector.broadcast %48 : vector<1x128xf32> to vector<32x128xf32>
    %50 = arith.addf %46, %49 : vector<32x128xf32>
    %51 = vector.broadcast %1 : f32 to vector<32x128xf32>
    %52 = arith.mulf %51, %50 : vector<32x128xf32>
    %cst_25 = arith.constant 1.000000e+00 : f32
    %53 = arith.subf %cst_25, %1 : f32
    %54 = vector.broadcast %53 : f32 to vector<32x128xf32>
    %55 = arith.mulf %54, %24 : vector<32x128xf32>
    %56 = arith.addf %52, %55 : vector<32x128xf32>
    %c0_26 = arith.constant 0 : index
    %c0_27 = arith.constant 0 : index
    %57 = vector.load %arg11[%c0_26, %c0_27] : memref<32x128xf32, #tpu.memory_space<vmem>>, vector<32x128xf32>
    tpu.vector_store %arg11[%c0_26, %c0_27], %56 {strides = array<i32>} : memref<32x128xf32, #tpu.memory_space<vmem>>, vector<32x128xf32>,
    return
  }
  func.func @transform_0(%arg0: i32, %arg1: memref<3xi32, #tpu.memory_space<smem>>, %arg2: memref<3xf32, #tpu.memory_space<smem>>, %arg3: memref<3xf32, #tpu.memory_space<smem>>) -> (i32, i32) {
    %c0_i32 = arith.constant 0 : i32
    %c0_i32_0 = arith.constant 0 : i32
    return %arg0, %c0_i32 : i32, i32
  }
  func.func @transform_1(%arg0: i32, %arg1: memref<3xi32, #tpu.memory_space<smem>>, %arg2: memref<3xf32, #tpu.memory_space<smem>>, %arg3: memref<3xf32, #tpu.memory_space<smem>>) -> (i32, i32, i32) {
    %0 = arith.index_cast %arg0 : i32 to index
    %1 = memref.load %arg1[%0] : memref<3xi32, #tpu.memory_space<smem>>
    %c0_i32 = arith.constant 0 : i32
    %c0_i32_0 = arith.constant 0 : i32
    %c0_i32_1 = arith.constant 0 : i32
    return %1, %c0_i32, %c0_i32_0 : i32, i32, i32
  }
  func.func @transform_2(%arg0: i32, %arg1: memref<3xi32, #tpu.memory_space<smem>>, %arg2: memref<3xf32, #tpu.memory_space<smem>>, %arg3: memref<3xf32, #tpu.memory_space<smem>>) -> (i32, i32, i32) {
    %0 = arith.index_cast %arg0 : i32 to index
    %1 = memref.load %arg1[%0] : memref<3xi32, #tpu.memory_space<smem>>
    %c0_i32 = arith.constant 0 : i32
    %c0_i32_0 = arith.constant 0 : i32
    %c0_i32_1 = arith.constant 0 : i32
    return %1, %c0_i32, %c0_i32_0 : i32, i32, i32
  }
  func.func @transform_3(%arg0: i32, %arg1: memref<3xi32, #tpu.memory_space<smem>>, %arg2: memref<3xf32, #tpu.memory_space<smem>>, %arg3: memref<3xf32, #tpu.memory_space<smem>>) -> (i32, i32, i32) {
    %0 = arith.index_cast %arg0 : i32 to index
    %1 = memref.load %arg1[%0] : memref<3xi32, #tpu.memory_space<smem>>
    %c0_i32 = arith.constant 0 : i32
    %c0_i32_0 = arith.constant 0 : i32
    %c0_i32_1 = arith.constant 0 : i32
    return %1, %c0_i32, %c0_i32_0 : i32, i32, i32
  }
  func.func @transform_4(%arg0: i32, %arg1: memref<3xi32, #tpu.memory_space<smem>>, %arg2: memref<3xf32, #tpu.memory_space<smem>>, %arg3: memref<3xf32, #tpu.memory_space<smem>>) -> (i32, i32, i32) {
    %0 = arith.index_cast %arg0 : i32 to index
    %1 = memref.load %arg1[%0] : memref<3xi32, #tpu.memory_space<smem>>
    %c0_i32 = arith.constant 0 : i32
    %c0_i32_0 = arith.constant 0 : i32
    %c0_i32_1 = arith.constant 0 : i32
    return %1, %c0_i32, %c0_i32_0 : i32, i32, i32
  }
  func.func @transform_5(%arg0: i32, %arg1: memref<3xi32, #tpu.memory_space<smem>>, %arg2: memref<3xf32, #tpu.memory_space<smem>>, %arg3: memref<3xf32, #tpu.memory_space<smem>>) -> (i32, i32, i32) {
    %0 = arith.index_cast %arg0 : i32 to index
    %1 = memref.load %arg1[%0] : memref<3xi32, #tpu.memory_space<smem>>
    %c0_i32 = arith.constant 0 : i32
    %c0_i32_0 = arith.constant 0 : i32
    %c0_i32_1 = arith.constant 0 : i32
    return %1, %c0_i32, %c0_i32_0 : i32, i32, i32
  }
  func.func @transform_6(%arg0: i32, %arg1: memref<3xi32, #tpu.memory_space<smem>>, %arg2: memref<3xf32, #tpu.memory_space<smem>>, %arg3: memref<3xf32, #tpu.memory_space<smem>>) -> (i32, i32, i32) {
    %0 = arith.index_cast %arg0 : i32 to index
    %1 = memref.load %arg1[%0] : memref<3xi32, #tpu.memory_space<smem>>
    %c0_i32 = arith.constant 0 : i32
    %c0_i32_0 = arith.constant 0 : i32
    %c0_i32_1 = arith.constant 0 : i32
    return %1, %c0_i32, %c0_i32_0 : i32, i32, i32
  }
  func.func @transform_7(%arg0: i32, %arg1: memref<3xi32, #tpu.memory_space<smem>>, %arg2: memref<3xf32, #tpu.memory_space<smem>>, %arg3: memref<3xf32, #tpu.memory_space<smem>>) -> (i32, i32) {
    %c0_i32 = arith.constant 0 : i32
    %c0_i32_0 = arith.constant 0 : i32
    return %arg0, %c0_i32 : i32, i32
  }
}

</mosaic_0001>

<bundles_post_ra>
// kernel: tpu_custom_call.1
= control target key start
LH: loop header
LB: loop body
LE: loop exit
PB: predicated region body
PF: predicated region fallthrough
CT: control target
= control target key end

     0   :  { %s1718_s19 = smov [#allocation3]   ;;  %s1719_s20 = smov [#allocation4]   ;;  %s2420_s0 = inlined_call_operand.hbm [shape: s32[3], index: 0, kind: input, shape index: {}]   ;;  %s2421_s3 = inlined_call_operand.hbm [shape: f32[96,128], index: 3, kind: input, shape index: {}]   ;;  %s2422_s4 = inlined_call_operand.hbm [shape: bf16[3,128,128], index: 4, kind: input, shape index: {}]   ;;  %s2423_s5 = inlined_call_operand.vmem [shape: f32[3,1,128], index: 5, kind: input, shape index: {}]   ;;  %s2424_s6 = inlined_call_operand.hbm [shape: bf16[3,128,128], index: 6, kind: input, shape index: {}]   ;;  %s2425_s7 = inlined_call_operand.vmem [shape: f32[3,1,128], index: 7, kind: input, shape index: {}]   ;;  %s2426_s8 = inlined_call_operand.hbm [shape: f32[3,1,128], index: 8, kind: input, shape index: {}]   ;;  %s2427_s9 = inlined_call_operand.hbm [shape: f32[3,1,128], index: 9, kind: input, shape index: {}]   ;;  %s2428_s10 = inlined_call_operand.hbm [shape: f32[96,128], index: 10, kind: output, shape index: {}]   ;;  %s2429_s1 = inlined_call_operand.hbm [shape: f32[3], index: 1, kind: input, shape index: {}]   ;;  %s2430_s2 = inlined_call_operand.hbm [shape: f32[3], index: 2, kind: input, shape index: {}]  }
   0x1   :  { %2455 = sst [smem:[#allocation46_spill]] %s2421_s3  ;;  %s16_s15 = sshll.u32 %s2420_s0, 4  ;;  %s17_s15 = int_to_ptr.hbm [resolvable:$true] %s16_s15 }
   0x2   :  { %2456 = sst [smem:[#allocation47_spill]] %s2422_s4  ;;  %s21_s18 = sshll.u32 %s2429_s1, 4  ;;  %s22_s18 = int_to_ptr.hbm [resolvable:$true] %s21_s18 }
   0x3   :  { %2457 = sst [smem:[#allocation48_spill]] %s2423_s5  ;;  %s26_s23 = sshll.u32 %s2430_s2, 4  ;;  %s27_s23 = int_to_ptr.hbm [resolvable:$true] %s26_s23 }
   0x4   :  { %2458 = sst [smem:[#allocation49_spill]] %s2424_s6  ;;  %s1720_s24 = smov [#allocation5]  }
   0x5   :  { %2459 = sst [smem:[#allocation50_spill]] %s2425_s7 }
   0x6   :  { %2460 = sst [smem:[#allocation51_spill]] %s2426_s8 }
   0x7   :  { %2461 = sst [smem:[#allocation52_spill]] %s2427_s9 }
   0x8   :  { %2462 = sst [smem:[#allocation53_spill]] %s2428_s10 }
   0x9   :  { %19 = dma.hbm_to_smem %s17_s15, 16, %s1718_s19, [#allocation2] }
   0xa   :  { %24 = dma.hbm_to_smem %s22_s18, 16, %s1719_s20, [#allocation2] }
   0xb   :  { %29 = dma.hbm_to_smem %s27_s23, 16, %s1720_s24, [#allocation2] }
   0xc   :  { %1628 = dma.done.wait [#allocation2], 48 }
   0xd   :  { %1629 = vsyncadd [#allocation2], 4294967248 }
   0xe   :  { %32 = sfence }
   0xf   :  { %33 = vsyncpa [#allocation7], 0 }
  0x10   :  { %35 = vsyncpa [#allocation7 + $0x1], 0 }
  0x11   :  { %36 = vsyncpa [#allocation10], 0 }
  0x12   :  { %38 = vsyncpa [#allocation10 + $0x1], 0 }
  0x13   :  { %39 = vsyncpa [#allocation13], 0 }
  0x14   :  { %41 = vsyncpa [#allocation13 + $0x1], 0 }
  0x15   :  { %42 = vsyncpa [#allocation8], 0 }
  0x16   :  { %44 = vsyncpa [#allocation8 + $0x1], 0  ;;  %s1791_s0 = smov 0   ;;  %s1793_s1 = smov 0  }
  0x17   :  { %s1795_s25 = smov 0   ;;  %s1797_s2 = smov 0  }
  0x18   :  { %s1799_s26 = smov 0   ;;  %s1801_s27 = smov 0  }
  0x19   :  { %s1803_s28 = smov 0   ;;  %s1805_s29 = smov 0  }
  0x1a   :  { %s1807_s30 = smov 0   ;;  %s1809_s11 = smov 0  }
  0x1b   :  { %s1811_s12 = smov 0   ;;  %s1813_s13 = smov 0  }
  0x1c   :  { %s1815_s14 = smov 0   ;;  %s1817_s15 = smov 0  }
  0x1d   :  { %s1819_s16 = smov 0   ;;  %s1821_s17 = smov 0  }
  0x1e LB: > { %2463 = sst [smem:[#allocation31_spill]] %s1656_s0  ;;  %s1870_s18 = sadd.s32 4294967295, %s1716_s17   ;;  %s1716_s17 = sphi %s1821_s17, %s2561_s17   ;;  %s1712_s16 = sphi %s1819_s16, %s2551_s16   ;;  %s1708_s15 = sphi %s1817_s15, %s2560_s15   ;;  %s1704_s14 = sphi %s1815_s14, %s2559_s14   ;;  %s1700_s13 = sphi %s1813_s13, %s2549_s13   ;;  %s1696_s12 = sphi %s1811_s12, %s2548_s12   ;;  %s1692_s11 = sphi %s1809_s11, %s2547_s11   ;;  %s1688_s30 = sphi %s1807_s30, %s2546_s30   ;;  %s1684_s29 = sphi %s1805_s29, %s2558_s29   ;;  %s1680_s28 = sphi %s1803_s28, %s2557_s28   ;;  %s1676_s27 = sphi %s1801_s27, %s2544_s27   ;;  %s1672_s26 = sphi %s1799_s26, %s2556_s26   ;;  %s1668_s2 = sphi %s1797_s2, %s2555_s2   ;;  %s1664_s25 = sphi %s1795_s25, %s2554_s25   ;;  %s1660_s1 = sphi %s1793_s1, %s2553_s1   ;;  %s1656_s0 = sphi %s1791_s0, %s2552_s0  }
  0x1f   : > { %2464 = sst [smem:[#allocation32_spill]] %s1664_s25  ;;  %s1873_s19 = sadd.s32 1, %s1716_s17  }
  0x20   : > { %2465 = sst [smem:[#allocation33_spill]] %s1676_s27  ;;  %p2446_p0 = scmp.eq.s32.totalorder %s1716_s17, 0 }
  0x21   : > { %2466 = sst [smem:[#allocation34_spill]] %s1688_s30  ;;  %p2445_p1 = scmp.eq.s32.totalorder %s1870_s18, 0 }
  0x22   : > { %2467 = sst [smem:[#allocation35_spill]] %s1696_s12  ;;  %s85_s21 = sadd.s32 1, %s1700_s13 }
  0x23   : > { %2468 = sst [smem:[#allocation36_spill]] %s1700_s13  ;;  %p92_p2 = scmp.ne.s32.totalorder %s1700_s13, %s1696_s12 }
  0x24   : > { %2469 = sst [smem:[#allocation37_spill]] %s1704_s14  ;;  %p98_p3 = scmp.ne.s32.totalorder %s1696_s12, %s1692_s11 }
  0x25   : > { %2470 = sst [smem:[#allocation38_spill]] %s1712_s16  ;;  %p1885_p4 = por %p92_p2, %p2446_p0 }
  0x26   : > { %s80_s20 = sld [smem:[#allocation3 + %s1716_s17]]  ;;  %p2442_p5 = scmp.lt.s32.totalorder %s1716_s17, 3 }
  0x27   : > { %s81_s22 = sld [smem:[#allocation3 + %s1873_s19]]  ;;  %p1892_p6 = por %p98_p3, %p2445_p1 }
  0x28   : > { %s312_s7 = sand.u32 1, %s1700_s13   ;;  %p1902_p7 = pnand %p2442_p5, %p1885_p4 }
  0x29   : > { %s2472_s24 = scalar_select %p1892_p6, 1, 0 }
  0x2a   : > { %s1035_s11 = sshll.u32 %s312_s7, 6  ;;  %p1041_p9 = scmp.ge.s32.totalorder %s1716_s17, 1 }
  0x2b   : > { %2473 = sst [smem:[#allocation39_spill]] %s2472_s24  ;;  %s314_s9 = scalar_lea.vmem [#allocation9], %s1035_s11 }
  0x2c   : > { %s1906_s6 = sshll.u32 %s314_s9, 4  ;;  %p406_p10 = scmp.lt.s32.totalorder %s1716_s17, 4 }
  0x2d   : > { %s82_s12 = ssub.s32 %s80_s20, %s81_s22  ;;  %2475 = sst [smem:[#allocation40_spill]] %s1906_s6 }
  0x2e   : > { %p83_p8 = scmp.eq.s32.totalorder %s82_s12, 0  ;;  %p1923_p11 = pnand %p1041_p9, %p406_p10 }
  0x2f   : > { %s1152_s10 = scalar_select %p1885_p4, [#allocation3], [#allocation16] }
  0x30   : > { %s1911_s24 = scalar_select %p83_p8, %s1700_s13, %s85_s21  }
  0x31   : > { %s1153_s7 = scalar_select %p1885_p4, %s1716_s17, 0 }
  0x32   : > { %2476 = sst [smem:[#allocation41_spill]] %s1911_s24  ;;  %s2563_s10 = smov (!%p2442_p5, %s1152_s10), [#allocation20] }
  0x33   : > { %s2565_s7 = smov (!%p2442_p5, %s1153_s7), 0  ;;  %s1928_s21 = sld [smem:[#allocation3 + %s1716_s17]] }
  0x34   : > { %s315_s12 = sld [smem:[%s2563_s10 + %s2565_s7]]  ;;  %s197_s0 = sadd.s32 1, %s1676_s27 }
  0x35   : > { %s2477_s9 = scalar_select %p1923_p11, 1, 0 }
  0x36   : > { %s2479_s4 = sld [smem:[#allocation47_spill]]  ;;  %p204_p12 = scmp.ne.s32.totalorder %s1676_s27, %s1672_s26 }
  0x37   : > { %2478 = sst [smem:[#allocation42_spill]] %s2477_s9  ;;  %s2480_s10 = sand.u32 1, %s1716_s17  }
  0x38   : > { %s193_s24 = sld [smem:[#allocation3 + %s1873_s19]]  ;;  %s1939_s7 = scalar_lea.sflag [#allocation10], %s2480_s10 }
  0x39   : > { %p1390_p2 = pneg %p1902_p7 }
  0x3a   : > { %s1116_s20 = sshll.u32 %s315_s12, 6 }
  0x3c   : > { %s320_s11 = scalar_lea.hbm %s2479_s4, %s1116_s20  ;;  %s1393_s20 = scalar_lea.hbm %s2479_s4, 192 }
  0x3d   : > { %s321_s13 = sshll.u32 %s320_s11, 4  ;;  %s322_s13 = int_to_ptr.hbm [resolvable:$true] %s321_s13 }
  0x3e   : > { %s1386_s6 = sshra.s32 %s322_s13, 4  ;;  %s1387_s6 = int_to_ptr.hbm [resolvable:$true] %s1386_s6 }
  0x3f   : > { %s1388_s25 = scalar_lea.hbm %s1387_s6, 64  ;;  %p1394_p8 = scmp.lt.s32.totalorder %s1387_s6, %s2479_s4 }
  0x40   : > { %p1389_p13 = scmp.ne.s32.totalorder %s1387_s6, %s1388_s25  ;;  %p1395_p9 = scmp.lt.s32.totalorder %s1393_s20, %s1388_s25 }
  0x42   : > { %p1391_p3 = pnand %p1390_p2, %p1389_p13  ;;  %p1396_p10 = por %p1395_p9, %p1394_p8 }
  0x44   : > { %p1392_p4 = pneg %p1391_p3 }
  0x46   : > { %p1397_p5 = pnand %p1396_p10, %p1392_p4 }
  0x48   : > { %1400 = shalt.err (!%p1397_p5)
}
  0x49   : > { %s2443_s11 = smov 64   ;;  %s2481_s10 = sld [smem:[#allocation40_spill]] }
  0x4a   : > { %s2444_s6 = smov 4   ;;  %p1962_p5 = por %p204_p12, %p2446_p0 }
  0x4b   : > { %p210_p13 = scmp.ne.s32.totalorder %s1672_s26, %s1668_s2  ;;  %s374_s12 = sand.u32 1, %s1676_s27  }
  0x4c   : > { %s194_s5 = ssub.s32 %s1928_s21, %s193_s24  ;;  %p2486_p12 = scmp.lt.s32.totalorder %s1716_s17, 3 }
  0x4d   : > { %p1972_p2 = por %p210_p13, %p2445_p1  ;;  %s375_s2 = scalar_lea.vmem [#allocation12], %s374_s12 }
  0x4e   : > { %s1159_s23 = scalar_select %p1962_p5, %s1716_s17, 0 }
  0x4f   : > { %s2482_s25 = int_to_ptr.vmem [resolvable:$true] %s2481_s10  ;;  %p2487_p3 = pmov %p2486_p12 }
  0x50   : > { %1179 = dma.hbm_to_vmem [thread:$0]  (!%p1902_p7), %s322_s13, 1024, %s2482_s25, %s1939_s7, %s2443_s11, %s2443_s11, %s2444_s6  }
  0x51   : > { %s2484_s20 = scalar_select %p1972_p2, 1, 0 }
  0x52   : > { %p195_p7 = scmp.eq.s32.totalorder %s194_s5, 0  ;;  %s2569_s23 = smov (!%p2487_p3, %s1159_s23), 0 }
  0x53   : > { %s1158_s13 = scalar_select %p1962_p5, [#allocation3], [#allocation18] }
  0x54   : > { %s1979_s22 = scalar_select %p195_p7, %s1676_s27, %s197_s0  }
  0x55   : > { %s2567_s13 = smov (!%p2486_p12, %s1158_s13), [#allocation22]  ;;  %s383_s24 = sshll.u32 %s375_s2, 4  ;;  %s384_s24 = int_to_ptr.vmem [resolvable:$true] %s383_s24 }
  0x56   : > { %2485 = sst [smem:[#allocation43_spill]] %s1979_s22  ;;  %p2488_p4 = pmov %p2487_p3 }
  0x57   : > { %s376_s10 = sld [smem:[%s2567_s13 + %s2569_s23]]  ;;  %s1029_s0 = sadd.s32 4294967294, %s1716_s17  }
  0x58   : > { %p1992_p8 = pnand %p2488_p4, %p1962_p5  ;;  %s54_s25 = ssub.s32 %s1716_s17, %s1873_s19 }
  0x59   : > { %s57_s5 = sadd.s32 1, %s1712_s16  ;;  %s2490_s8 = sld [smem:[#allocation51_spill]] }
  0x5a   : > { %p2003_p9 = scmp.eq.s32.totalorder %s54_s25, 0  ;;  %p64_p10 = scmp.ne.s32.totalorder %s1712_s16, %s1708_s15 }
  0x5b   : > { %s2492_s12 = sand.u32 1, %s1716_s17   ;;  %p1420_p7 = pneg %p1992_p8 }
  0x5c   : > { %s2013_s2 = scalar_lea.sflag [#allocation13], %s2492_s12 }
  0x5f   : > { %s379_s4 = scalar_lea.hbm %s2490_s8, %s376_s10  ;;  %s1423_s10 = scalar_lea.hbm %s2490_s8, 3 }
  0x60   : > { %s381_s9 = sshll.u32 %s379_s4, 4  ;;  %s382_s9 = int_to_ptr.hbm [resolvable:$true] %s381_s9 }
  0x61   : > { %s1416_s13 = sshra.s32 %s382_s9, 4  ;;  %s1417_s13 = int_to_ptr.hbm [resolvable:$true] %s1416_s13 }
  0x62   : > { %s1418_s23 = scalar_lea.hbm %s1417_s13, 1  ;;  %p1424_p4 = scmp.lt.s32.totalorder %s1417_s13, %s2490_s8 }
  0x63   : > { %p1419_p13 = scmp.ne.s32.totalorder %s1417_s13, %s1418_s23  ;;  %p1425_p1 = scmp.lt.s32.totalorder %s1423_s10, %s1418_s23 }
  0x65   : > { %p1421_p12 = pnand %p1420_p7, %p1419_p13  ;;  %p1426_p5 = por %p1425_p1, %p1424_p4 }
  0x67   : > { %p1422_p3 = pneg %p1421_p12 }
  0x69   : > { %p1427_p0 = pnand %p1426_p5, %p1422_p3 }
  0x6b   : > { %1430 = shalt.err (!%p1427_p0)
}
  0x6c   : > { %1189 = dma.hbm_to_vmem [thread:$0]  (!%p1992_p8), %s382_s9, 16, %s384_s24, %s2013_s2  }
  0x6d   : > { %s2029_s12 = scalar_select %p2003_p9, %s1712_s16, %s57_s5  }
  0x6e   : > { %p2494_p0 = scmp.eq.s32.totalorder %s1716_s17, 0  ;;  %p2496_p5 = scmp.ne.s32.totalorder %s1708_s15, %s1704_s14 }
  0x6f   : > { %2493 = sst [smem:[#allocation44_spill]] %s2029_s12  ;;  %p2497_p13 = scmp.eq.s32.totalorder %s1870_s18, 0 }
  0x70   : > { %p2036_p1 = por %p2494_p0, %p64_p10  ;;  %p262_p12 = scmp.eq.s32.totalorder %s1870_s18, 2 }
  0x71   : > { %p2045_p7 = por %p2497_p13, %p2496_p5  ;;  %p268_p3 = scmp.eq.s32.totalorder %s1029_s0, 2 }
  0x72   : > { %s288_s24 = sand.u32 1, %s1712_s16   ;;  %s1115_s22 = sshll.u32 %s1716_s17, 5 }
  0x73   : > { %p2055_p8 = por %p262_p12, %p64_p10  ;;  %p2500_p9 = pmov %p2496_p5 }
  0x74   : > { %s1032_s23 = sshll.u32 %s288_s24, 5  ;;  %s2503_s3 = sld [smem:[#allocation46_spill]] }
  0x75   : > { %s2499_s5 = scalar_select %p2055_p8, 1, 0 }
  0x76   : > { %p2062_p4 = por %p268_p3, %p2500_p9  ;;  %s292_s4 = scalar_lea.vmem [#allocation6], %s1032_s23 }
  0x77   : > { %s300_s0 = sshll.u32 %s292_s4, 4  ;;  %p2504_p10 = scmp.lt.s32.totalorder %s1716_s17, 3  ;;  %s301_s0 = int_to_ptr.vmem [resolvable:$true] %s300_s0 }
  0x78   : > { %s2501_s9 = scalar_select %p2062_p4, 1, 0 }
  0x79   : > { %p2073_p0 = pnand %p2504_p10, %p2036_p1  ;;  %s289_s12 = scalar_lea.sflag [#allocation7], %s288_s24 }
  0x7a   : > { %2502 = sst [smem:[#allocation40_spill]] %s2501_s9  ;;  %s297_s10 = scalar_lea.hbm %s2503_s3, %s1115_s22 }
  0x7b   : > { %s298_s25 = sshll.u32 %s297_s10, 4  ;;  %p1450_p13 = pneg %p2073_p0  ;;  %s299_s25 = int_to_ptr.hbm [resolvable:$true] %s298_s25 }
  0x7c   : > { %s1446_s16 = sshra.s32 %s299_s25, 4  ;;  %s1453_s11 = scalar_lea.hbm %s2503_s3, 96  ;;  %s1447_s16 = int_to_ptr.hbm [resolvable:$true] %s1446_s16 }
  0x7d   : > { %s1448_s27 = scalar_lea.hbm %s1447_s16, 32  ;;  %p1454_p1 = scmp.lt.s32.totalorder %s1447_s16, %s2503_s3 }
  0x7e   : > { %p1449_p5 = scmp.ne.s32.totalorder %s1447_s16, %s1448_s27  ;;  %p1455_p9 = scmp.lt.s32.totalorder %s1453_s11, %s1448_s27 }
  0x80   : > { %p1451_p12 = pnand %p1450_p13, %p1449_p5  ;;  %p1456_p10 = por %p1455_p9, %p1454_p1 }
  0x82   : > { %p1452_p3 = pneg %p1451_p12 }
  0x84   : > { %p1457_p4 = pnand %p1456_p10, %p1452_p3 }
  0x86   : > { %1460 = shalt.err (!%p1457_p4)
}
  0x87   : > { %s1723_s24 = smov 128   ;;  %s1724_s10 = smov 8  }
  0x88   : > { %1174 = dma.hbm_to_vmem [thread:$0]  (!%p2073_p0), %s299_s25, 512, %s301_s0, %s289_s12, %s1723_s24, %s1723_s24, %s1724_s10  }
  0x89   : > { %s136_s27 = sld [smem:[#allocation3 + %s1716_s17]]  ;;  %p148_p4 = scmp.ne.s32.totalorder %s1688_s30, %s1684_s29 }
  0x8a   : > { %s137_s16 = sld [smem:[#allocation3 + %s1873_s19]]  ;;  %p154_p5 = scmp.ne.s32.totalorder %s1684_s29, %s1680_s28 }
  0x8b   : > { %s343_s4 = sand.u32 1, %s1688_s30   ;;  %p2506_p13 = scmp.eq.s32.totalorder %s1716_s17, 0 }
  0x8c   : > { %p2507_p3 = scmp.eq.s32.totalorder %s1870_s18, 0  ;;  %s2509_s8 = sld [smem:[#allocation32_spill]] }
  0x8d   : > { %p150_p12 = por %p148_p4, %p2506_p13  ;;  %s1038_s23 = sshll.u32 %s343_s4, 6 }
  0x8e   : > { %p2098_p1 = por %p154_p5, %p2507_p3  ;;  %s2510_s12 = sld [smem:[#allocation31_spill]] }
  0x8f   : > { %s1155_s25 = scalar_select %p150_p12, [#allocation3], [#allocation17] }
  0x90   : > { %s2508_s22 = scalar_select %p2098_p1, 1, 0 }
  0x91   : > { %s1156_s0 = scalar_select %p150_p12, %s1716_s17, 0 }
  0x92   : > { %s138_s11 = ssub.s32 %s136_s27, %s137_s16  ;;  %s141_s21 = sadd.s32 1, %s1688_s30 }
  0x93   : > { %p139_p0 = scmp.eq.s32.totalorder %s138_s11, 0  ;;  %p2511_p9 = scmp.lt.s32.totalorder %s1716_s17, 3 }
  0x94   : > { %s2118_s10 = sld [smem:[#allocation3 + %s1716_s17]]  ;;  %s345_s4 = scalar_lea.vmem [#allocation11], %s1038_s23 }
  0x95   : > { %s2571_s25 = smov (!%p2511_p9, %s1155_s25), [#allocation21]  ;;  %p2513_p10 = pmov %p2511_p9 }
  0x96   : > { %s2107_s28 = scalar_select %p139_p0, %s1688_s30, %s141_s21  }
  0x97   : > { %s2573_s0 = smov (!%p2513_p10, %s1156_s0), 0  ;;  %p2514_p4 = pmov %p2511_p9 }
  0x98   : > { %2512 = sst [smem:[#allocation45_spill]] %s2107_s28  ;;  %s2120_s27 = sshll.u32 %s345_s4, 4  ;;  %s355_s27 = int_to_ptr.vmem [resolvable:$true] %s2120_s27 }
  0x99   : > { %p2113_p5 = pnand %p2514_p4, %p150_p12  ;;  %s346_s24 = sld [smem:[%s2571_s25 + %s2573_s0]] }
  0x9a   : > { %s221_s16 = sld [smem:[#allocation3 + %s1873_s19]]  ;;  %p232_p13 = scmp.ne.s32.totalorder %s2509_s8, %s1660_s1 }
  0x9b   : > { %p238_p3 = scmp.ne.s32.totalorder %s1660_s1, %s2510_s12  ;;  %s2516_s28 = sld [smem:[#allocation49_spill]] }
  0x9c   : > { %p2518_p12 = scmp.eq.s32.totalorder %s1870_s18, 0  ;;  %p2520_p9 = scmp.eq.s32.totalorder %s1716_s17, 0 }
  0x9d   : > { %p1480_p8 = pneg %p2113_p5 }
  0x9e   : > { %p2133_p0 = por %p238_p3, %p2518_p12  ;;  %p2139_p10 = por %p232_p13, %p2520_p9 }
  0x9f   : > { %s1117_s11 = sshll.u32 %s346_s24, 6 }
  0xa1   : > { %s2517_s9 = smov %s2516_s28  ;;  %s351_s30 = scalar_lea.hbm %s2516_s28, %s1117_s11 }
  0xa2   : > { %s352_s14 = sshll.u32 %s351_s30, 4  ;;  %s1483_s28 = scalar_lea.hbm %s2517_s9, 192  ;;  %s353_s14 = int_to_ptr.hbm [resolvable:$true] %s352_s14 }
  0xa3   : > { %s1476_s0 = sshra.s32 %s353_s14, 4  ;;  %s1477_s0 = int_to_ptr.hbm [resolvable:$true] %s1476_s0 }
  0xa4   : > { %s1478_s12 = scalar_lea.hbm %s1477_s0, 64  ;;  %p1484_p3 = scmp.lt.s32.totalorder %s1477_s0, %s2517_s9 }
  0xa5   : > { %p1479_p4 = scmp.ne.s32.totalorder %s1477_s0, %s1478_s12  ;;  %p1485_p13 = scmp.lt.s32.totalorder %s1483_s28, %s1478_s12 }
  0xa7   : > { %p1481_p2 = pnand %p1480_p8, %p1479_p4  ;;  %p1486_p12 = por %p1485_p13, %p1484_p3 }
  0xa9   : > { %p1482_p1 = pneg %p1481_p2 }
  0xab   : > { %p1487_p9 = pnand %p1486_p12, %p1482_p1 }
  0xad   : > { %1490 = shalt.err (!%p1487_p9)
}
  0xae   : > { %s2522_s11 = smov 4   ;;  %s2523_s21 = smov 64  }
  0xaf   : > { %1184 = dma.hbm_to_vmem [thread:$0]  (!%p2113_p5), %s353_s14, 1024, %s355_s27, %s1939_s7, %s2523_s21, %s2523_s21, %s2522_s11  }
  0xb0   : > { %s222_s0 = ssub.s32 %s2118_s10, %s221_s16  ;;  %s225_s12 = sadd.s32 1, %s2509_s8 }
  0xb1   : > { %p223_p2 = scmp.eq.s32.totalorder %s222_s0, 0  ;;  %s392_s6 = sand.u32 1, %s2509_s8  }
  0xb2   : > { %s1161_s3 = scalar_select %p2139_p10, [#allocation3], [#allocation19] }
  0xb3   : > { %s2575_s8 = smov (!%p223_p2, %s2509_s8), %s225_s12  ;;  %p2524_p8 = scmp.lt.s32.totalorder %s1716_s17, 3 }
  0xb4   : > { %s1162_s30 = scalar_select %p2139_p10, %s1716_s17, 0 }
  0xb5   : > { %s2577_s3 = smov (!%p2524_p8, %s1161_s3), [#allocation23]  ;;  %p2525_p1 = pmov %p2524_p8 }
  0xb6   : > { %s393_s7 = scalar_lea.vmem [#allocation14], %s392_s6  ;;  %s2528_s24 = sld [smem:[#allocation52_spill]] }
  0xb7   : > { %s2579_s30 = smov (!%p2525_p1, %s1162_s30), 0  ;;  %p2526_p4 = pmov %p2525_p1 }
  0xb8   : > { %s394_s14 = sld [smem:[%s2577_s3 + %s2579_s30]]  ;;  %s401_s10 = sshll.u32 %s393_s7, 4  ;;  %s402_s10 = int_to_ptr.vmem [resolvable:$true] %s401_s10 }
  0xb9   : > { %p2176_p3 = pnand %p2526_p4, %p2139_p10 }
  0xbb   : > { %p1510_p10 = pneg %p2176_p3 }
  0xbc   : > { %s1513_s6 = scalar_lea.hbm %s2528_s24, 3 }
  0xbe   : > { %s397_s4 = scalar_lea.hbm %s2528_s24, %s394_s14 }
  0xbf   : > { %s399_s11 = sshll.u32 %s397_s4, 4  ;;  %s400_s11 = int_to_ptr.hbm [resolvable:$true] %s399_s11 }
  0xc0   : > { %s1506_s21 = sshra.s32 %s400_s11, 4  ;;  %s1507_s21 = int_to_ptr.hbm [resolvable:$true] %s1506_s21 }
  0xc1   : > { %s1508_s0 = scalar_lea.hbm %s1507_s21, 1  ;;  %p1514_p9 = scmp.lt.s32.totalorder %s1507_s21, %s2528_s24 }
  0xc2   : > { %p1509_p5 = scmp.ne.s32.totalorder %s1507_s21, %s1508_s0  ;;  %p1515_p2 = scmp.lt.s32.totalorder %s1513_s6, %s1508_s0 }
  0xc4   : > { %p1511_p13 = pnand %p1510_p10, %p1509_p5  ;;  %p1516_p8 = por %p1515_p2, %p1514_p9 }
  0xc6   : > { %p1512_p12 = pneg %p1511_p13 }
  0xc8   : > { %p1517_p1 = pnand %p1516_p8, %p1512_p12 }
  0xca   : > { %1520 = shalt.err (!%p1517_p1)
}
  0xcb   : > { %1194 = dma.hbm_to_vmem [thread:$0]  (!%p2176_p3), %s400_s11, 16, %s402_s10, %s2013_s2  }
  0xcc   : > { %410 = sbr.rel (%p1923_p11) target bundleno = 715 (0x2cb), region = 48  ;;  %s2197_s7 = sand.u32 (!%p1923_p11), 1, %s1708_s15  }
  0xcd   : > { %s1042_s27 = sshll.u32 (!%p1923_p11), %s2197_s7, 5  ;;  %s413_s16 = scalar_lea.sflag (!%p1923_p11), [#allocation7], %s2197_s7 }
  0xce   : > { %s2203_s4 = scalar_lea.vmem (!%p1923_p11), [#allocation6], %s1042_s27 }
  0xd1   : > { %1631 = dma.done.wait (%p2045_p7), %s413_s16, 512  }
  0xd2   : > { %1633 = vsyncadd (%p2045_p7), %s413_s16, 4294966784  ;;  %s2530_s2 = sld [smem:[#allocation35_spill]]  ;;  %s422_s10 = sand.u32 1, %s1870_s18  }
  0xd3   : > { %s423_s0 = scalar_lea.sflag [#allocation10], %s422_s10 }
  0xd8   : > { %s424_s11 = sand.u32 1, %s2530_s2  }
  0xd9   : > { %s1043_s21 = sshll.u32 %s424_s11, 6 }
  0xda   : > { %s2211_s23 = scalar_lea.vmem [#allocation9], %s1043_s21 }
  0xdb   : > { %1635 = dma.done.wait (%p1892_p6), %s423_s0, 1024  }
  0xdc   : > { %1637 = vsyncadd (%p1892_p6), %s423_s0, 4294966272  ;;  %s434_s12 = sand.u32 1, %s1684_s29   ;;  %p2532_p11 = scmp.ne.s32.totalorder %s2508_s22, 0 }
  0xdd   : > { %s1044_s6 = sshll.u32 %s434_s12, 6 }
  0xde   : > { %s2218_s13 = scalar_lea.vmem [#allocation11], %s1044_s6 }
  0xdf   : > { %1639 = dma.done.wait (%p2532_p11), %s423_s0, 1024  }
  0xe0   : > { %1641 = vsyncadd (%p2532_p11), %s423_s0, 4294966272  ;;  %s444_s3 = sand.u32 1, %s1672_s26   ;;  %s443_s30 = scalar_lea.sflag [#allocation13], %s422_s10 }
  0xe1   : > { %s2225_s14 = scalar_lea.vmem [#allocation12], %s444_s3  ;;  %p2533_p7 = scmp.ne.s32.totalorder %s2484_s20, 0 }
  0xe3   : > { %1643 = dma.done.wait (%p2533_p7), %s443_s30, 16  }
  0xe4   : > { %1645 = vsyncadd (%p2533_p7), %s443_s30, 4294967280  ;;  %s453_s16 = sand.u32 1, %s1660_s1  }
  0xe5   : > { %s2232_s2 = scalar_lea.vmem [#allocation14], %s453_s16 }
  0xe6   : > { %1647 = dma.done.wait (%p2133_p0), %s443_s30, 16  }
  0xe7   : > { %1649 = vsyncadd (%p2133_p0), %s443_s30, 4294967280  ;;  %s514_s22 = sld [smem:[#allocation3 + %s1870_s18]]  ;;  %v1125_v0 = vld [vmem:[%s2211_s23 + $0x38] sm:$0xff]  ;;  %v1124_v1 = vld [vmem:[%s2211_s23 + $0x30] sm:$0xff]  ;;  %p2538_p3 = scmp.ne.s32.totalorder %s2499_s5, 0 }
  0xe8   : > { %604 = vmatpush.bf16.msra.mxu0 %v1125_v0  ;;  %1135 = vmatpush.bf16.msra.mxu2 %v1125_v0  ;;  %v1133_v2 = vld [vmem:[%s2218_s13 + $0x38] sm:$0xff]  ;;  %s2534_s28 = sld [smem:[#allocation48_spill]]  ;;  %v1123_v3 = vld [vmem:[%s2211_s23 + $0x28] sm:$0xff]  ;;  %v1132_v4 = vld [vmem:[%s2218_s13 + $0x30] sm:$0xff] }
  0xe9   : > { %697 = vmatpush.bf16.msra.mxu1 %v1133_v2  ;;  %1143 = vmatpush.bf16.msra.mxu3 %v1133_v2  ;;  %v1122_v5 = vld [vmem:[%s2211_s23 + $0x20] sm:$0xff]  ;;  %v1131_v6 = vld [vmem:[%s2218_s13 + $0x28] sm:$0xff]  ;;  %v1121_v7 = vld [vmem:[%s2211_s23 + $0x18] sm:$0xff]  ;;  %s520_s21 = sld [smem:[#allocation3 + %s1870_s18]] }
  0xea   : > { %v1130_v8 = vld [vmem:[%s2218_s13 + $0x20] sm:$0xff]  ;;  %v1120_v9 = vld [vmem:[%s2211_s23 + $0x10] sm:$0xff]  ;;  %v1119_v10 = vld [vmem:[%s2211_s23 + $0x8] sm:$0xff]  ;;  %s2536_s12 = sld [smem:[#allocation50_spill]] }
  0xeb   : > { %v1118_v11 = vld [vmem:[%s2211_s23] sm:$0xff]  ;;  %v531_v13 = vld [vmem:[%s2203_s4 + $0x8] sm:$0xff]  ;;  %v532_v14 = vld [vmem:[%s2203_s4 + $0x10] sm:$0xff]  ;;  %s2301_s30 = sld [smem:[#allocation4 + %s1870_s18]] }
  0xec   : > { %605 = vmatpush.bf16.msra.mxu0 %v1124_v1  ;;  %1136 = vmatpush.bf16.msra.mxu2 %v1124_v1  ;;  %v530_v12 = vld [vmem:[%s2203_s4] sm:$0xff]  ;;  %v533_v15 = vld [vmem:[%s2203_s4 + $0x18] sm:$0xff]  ;;  %v1128_v19 = vld [vmem:[%s2218_s13 + $0x10] sm:$0xff]  ;;  %s2537_s20 = sld [smem:[#allocation53_spill]] }
  0xed   : > { %p515_p6 = scmp.lt.s32.totalorder %s514_s22, 2  ;;  %698 = vmatpush.bf16.msra.mxu1 %v1132_v4  ;;  %1144 = vmatpush.bf16.msra.mxu3 %v1132_v4  ;;  %v534_v16 = vpack.c.bf16 %v531_v13, %v530_v12  ;;  %v535_v17 = vpack.c.bf16 %v533_v15, %v532_v14  ;;  %v1129_v18 = vld [vmem:[%s2218_s13 + $0x18] sm:$0xff]  ;;  %v1127_v20 = vld [vmem:[%s2218_s13 + $0x8] sm:$0xff]  ;;  %v1126_v21 = vld [vmem:[%s2218_s13] sm:$0xff]  ;;  %s529_s13 = sld [smem:[#allocation5 + %s1870_s18]] }
  0xef   : > { %s2581_s22 = smov (!%p515_p6, %s514_s22), 2  ;;  %p521_p0 = scmp.lt.s32.totalorder %s520_s21, 2 }
  0xf0   : > { %s517_s11 = scalar_lea.vmem %s2534_s28, %s2581_s22  ;;  %606 = vmatpush.bf16.msra.mxu0 %v1123_v3  ;;  %1137 = vmatpush.bf16.msra.mxu2 %v1123_v3 }
  0xf1   : > { %699 = vmatpush.bf16.msra.mxu1 %v1131_v6  ;;  %1145 = vmatpush.bf16.msra.mxu3 %v1131_v6  ;;  %s2583_s21 = smov (!%p521_p0, %s520_s21), 2  ;;  %v1338_v23 = vld [vmem:[%s517_s11] ss:$0 sm:$0xff]  ;;  %s830_s16 = ssub.f32 1.0, %s2301_s30 }
  0xf2   : > { %s523_s6 = scalar_lea.vmem %s2536_s12, %s2583_s21 }
  0xf3   : > { %v1339_v37 = vld [vmem:[%s523_s6] ss:$0 sm:$0xff]  ;;  %v740_v54 = vstv %s529_s13  ;;  %s1556_s6 = scalar_lea.hbm %s2537_s20, 96 }
  0xf4   : > { %607 = vmatpush.bf16.msra.mxu0 %v1122_v5  ;;  %1138 = vmatpush.bf16.msra.mxu2 %v1122_v5 }
  0xf5   : > { %700 = vmatpush.bf16.msra.mxu1 %v1130_v8  ;;  %1146 = vmatpush.bf16.msra.mxu3 %v1130_v8 }
  0xf8   : > { %608 = vmatpush.bf16.msra.mxu0 %v1121_v7  ;;  %1139 = vmatpush.bf16.msra.mxu2 %v1121_v7 }
  0xf9   : > { %701 = vmatpush.bf16.msra.mxu1 %v1129_v18  ;;  %1147 = vmatpush.bf16.msra.mxu3 %v1129_v18 }
  0xfc   : > { %609 = vmatpush.bf16.msra.mxu0 %v1120_v9  ;;  %1140 = vmatpush.bf16.msra.mxu2 %v1120_v9 }
  0xfd   : > { %702 = vmatpush.bf16.msra.mxu1 %v1128_v19  ;;  %1148 = vmatpush.bf16.msra.mxu3 %v1128_v19 }
 0x100   : > { %610 = vmatpush.bf16.msra.mxu0 %v1119_v10  ;;  %1141 = vmatpush.bf16.msra.mxu2 %v1119_v10 }
 0x101   : > { %703 = vmatpush.bf16.msra.mxu1 %v1127_v20  ;;  %1149 = vmatpush.bf16.msra.mxu3 %v1127_v20 }
 0x104   : > { %611 = vmatpush.bf16.msra.mxu0 %v1118_v11  ;;  %1142 = vmatpush.bf16.msra.mxu2 %v1118_v11 }
 0x105   : > { %704 = vmatpush.bf16.msra.mxu1 %v1126_v21  ;;  %1150 = vmatpush.bf16.msra.mxu3 %v1126_v21 }
 0x107   : > { %612 = vmatmul.bf16.vlgmr.msra.gmra.mxu0 %v534_v16  ;;  %617 = vmatmul.bf16.vlgmr.msra.gmra.mxu2 %v535_v17 }
 0x184   : > { %v613_v22 = vpop.f32.mrf.mxu0 }
 0x185   : > { %v614_v24 = vadd.f32 %v1338_v23, %v613_v22  ;;  %v2308_v22 = vld [vmem:[%s2225_s14] ss:$0 sm:$0xff]  ;;  %s2327_s14 = scalar_lea.vmem [#allocation15], %s1042_s27  ;;  %s1134_s27 = sshll.u32 %s1870_s18, 5 }
 0x186   : > { %s856_s25 = scalar_lea.hbm %s2537_s20, %s1134_s27  ;;  %s857_s28 = sshll.u32 %s2327_s14, 4  ;;  %s858_s28 = int_to_ptr.vmem [resolvable:$true] %s857_s28 }
 0x187   : > { %v623_v27 = vmax.f32 %v614_v24, 0.0  ;;  %s859_s11 = sshll.u32 %s856_s25, 4  ;;  %s845_s18 = scalar_lea.sflag [#allocation8], %s2197_s7  ;;  %s860_s11 = int_to_ptr.hbm [resolvable:$true] %s859_s11 }
 0x188   : > { %s1550_s21 = sshra.s32 %s860_s11, 4  ;;  %s1551_s21 = int_to_ptr.hbm [resolvable:$true] %s1550_s21 }
 0x189   : > { %s1552_s0 = scalar_lea.hbm %s1551_s21, 32  ;;  %p1557_p13 = scmp.lt.s32.totalorder %s1551_s21, %s2537_s20 }
 0x18a   : > { %v618_v25 = vpop.f32.mrf.mxu2  ;;  %p1553_p4 = scmp.ne.s32.totalorder %s1551_s21, %s1552_s0  ;;  %p1558_p12 = scmp.lt.s32.totalorder %s1556_s6, %s1552_s0 }
 0x18b   : > { %v619_v30 = vadd.f32 %v1338_v23, %v618_v25 }
 0x18c   : > { %v615_v26 = vpop.f32.mrf.mxu0  ;;  %p1554_p5 = pnand %p1553_p4, %p2538_p3  ;;  %p1559_p9 = por %p1558_p12, %p1557_p13 }
 0x18d   : > { %v616_v28 = vadd.f32 %v1338_v23, %v615_v26  ;;  %v625_v34 = vmax.f32 %v619_v30, 0.0  ;;  %v2313_v26 = vld [vmem:[%s2232_s2] ss:$0 sm:$0xff] }
 0x18e   : > { %p1555_p10 = pneg %p1554_p5 }
 0x18f   : > { %v624_v29 = vmax.f32 %v616_v28, 0.0 }
 0x190   : > { %p1560_p2 = pnand %p1559_p9, %p1555_p10 }
 0x191   : > { %v627_v31 = vpack.c.bf16 %v624_v29, %v623_v27 }
 0x192   : > { %v620_v32 = vpop.f32.mrf.mxu2 }
 0x193   : > { %v621_v33 = vadd.f32 %v1338_v23, %v620_v32  ;;  %705 = vmatmul.bf16.vlgmr.msra.gmra.mxu1 %v627_v31  ;;  %v2315_v31 = vstv %s830_s16 }
 0x195   : > { %v626_v35 = vmax.f32 %v621_v33, 0.0 }
 0x197   : > { %v628_v36 = vpack.c.bf16 %v626_v35, %v625_v34  ;;  %v825_v35 = vstv %s2301_s30 }
 0x199   : > { %710 = vmatmul.bf16.vlgmr.msra.gmra.mxu3 %v628_v36 }
 0x210   : > { %v706_v38 = vpop.f32.mrf.mxu1 }
 0x211   : > { %v707_v39 = vadd.f32 %v1339_v37, %v706_v38 }
 0x213   : > { %v2277_v40 = vmax.f32 %v707_v39, 0.0 }
 0x215   : > { %720 = vadd.xlane.f32.xlu0 %v2277_v40  ;;  %v728_v41 = vmul.f32 %v2277_v40, %v2277_v40 }
 0x217   : > { %732 = vadd.xlane.f32.xlu2 %v728_v41 }
 0x218   : > { %v708_v42 = vpop.f32.mrf.mxu1 }
 0x219   : > { %v709_v43 = vadd.f32 %v1339_v37, %v708_v42 }
 0x21b   : > { %v2282_v44 = vmax.f32 %v709_v43, 0.0  ;;  %v832_v43 = vmul.f32 %v2315_v31, %v2277_v40 }
 0x21c   : > { %v711_v45 = vpop.f32.mrf.mxu3 }
 0x21d   : > { %v712_v46 = vadd.f32 %v1339_v37, %v711_v45  ;;  %722 = vadd.xlane.f32.xlu0 %v2282_v44  ;;  %v729_v47 = vmul.f32 %v2282_v44, %v2282_v44 }
 0x21f   : > { %v2287_v48 = vmax.f32 %v712_v46, 0.0  ;;  %734 = vadd.xlane.f32.xlu2 %v729_v47 }
 0x221   : > { %724 = vadd.xlane.f32.xlu1 %v2287_v48  ;;  %v730_v49 = vmul.f32 %v2287_v48, %v2287_v48 }
 0x224   : > { %v713_v50 = vpop.f32.mrf.mxu3 }
 0x225   : > { %v714_v51 = vadd.f32 %v1339_v37, %v713_v50  ;;  %736 = vadd.xlane.f32.xlu0 %v730_v49 }
 0x227   : > { %v2292_v52 = vmax.f32 %v714_v51, 0.0 }
 0x229   : > { %726 = vadd.xlane.f32.xlu1 %v2292_v52  ;;  %v731_v53 = vmul.f32 %v2292_v52, %v2292_v52 }
 0x231   : > { %738 = vadd.xlane.f32.xlu1 %v731_v53 }
 0x288   : > { %v721_v55 = vpop.xlane.xlu0 %720 }
 0x289   : > { %v741_v56 = vmul.f32 %v740_v54, %v721_v55 }
 0x28a   : > { %v733_v57 = vpop.xlane.xlu2 %732 }
 0x28b   : > { %v749_v58 = vmul.f32 %v741_v56, %v741_v56  ;;  %v745_v59 = vmul.f32 %v740_v54, %v733_v57  ;;  %v757_v21 = vsub.f32 %v2277_v40, %v741_v56 }
 0x28d   : > { %v753_v60 = vsub.f32 %v745_v59, %v749_v58 }
 0x28f   : > { %v761_v61 = vadd.f32 1e-05, %v753_v60  ;;  %v833_v60 = vmul.f32 %v2315_v31, %v2282_v44 }
 0x290   : > { %v723_v62 = vpop.xlane.xlu0 %722 }
 0x291   : > { %1342 = vrsqrt.f32 %v761_v61  ;;  %v742_v63 = vmul.f32 %v740_v54, %v723_v62  ;;  %vm771_vm1 = vweird.f32 %v761_v61 }
 0x292   : > { %v735_v0 = vpop.xlane.xlu2 %734 }
 0x293   : > { %v750_v1 = vmul.f32 %v742_v63, %v742_v63  ;;  %v746_v2 = vmul.f32 %v740_v54, %v735_v0  ;;  %v758_v46 = vsub.f32 %v2282_v44, %v742_v63 }
 0x294   : > { %v725_v3 = vpop.xlane.xlu1 %724 }
 0x295   : > { %v754_v4 = vsub.f32 %v746_v2, %v750_v1  ;;  %v2298_v5 = vmul.f32 %v740_v54, %v725_v3 }
 0x297   : > { %v1343_v6 = vpop.eup %1342  ;;  %v762_v7 = vadd.f32 1e-05, %v754_v4  ;;  %v751_v10 = vmul.f32 %v2298_v5, %v2298_v5  ;;  %v759_v57 = vsub.f32 %v2287_v48, %v2298_v5  ;;  %v834_v5 = vmul.f32 %v2315_v31, %v2287_v48 }
 0x298   : > { %v766_v8 = vmul.f32 %v1343_v6, %v761_v61  ;;  %v737_v9 = vpop.xlane.xlu0 %736  ;;  %vm772_vm0 = vweird.f32 %v1343_v6 }
 0x299   : > { %1344 = vrsqrt.f32 %v762_v7  ;;  %v747_v11 = vmul.f32 %v740_v54, %v737_v9  ;;  %vm773_vm2 = vmor %vm771_vm1, %vm772_vm0  ;;  %vm781_vm4 = vweird.f32 %v762_v7 }
 0x29a   : > { %v767_v12 = vmul.f32 %v1343_v6, %v766_v8 }
 0x29b   : > { %v755_v13 = vsub.f32 %v747_v11, %v751_v10 }
 0x29c   : > { %v768_v14 = vmul.f32 0.5, %v767_v12  ;;  %v727_v15 = vpop.xlane.xlu1 %726 }
 0x29d   : > { %v763_v16 = vadd.f32 1e-05, %v755_v13  ;;  %v2310_v23 = vmul.f32 %v740_v54, %v727_v15  ;;  %v835_v13 = vmul.f32 %v2315_v31, %v2292_v52 }
 0x29e   : > { %v769_v17 = vsub.f32 1.5, %v768_v14 }
 0x29f   : > { %v1345_v18 = vpop.eup %1344  ;;  %1346 = vrsqrt.f32 %v763_v16  ;;  %v752_v33 = vmul.f32 %v2310_v23, %v2310_v23  ;;  %vm791_vm7 = vweird.f32 %v763_v16  ;;  %v760_v9 = vsub.f32 %v2292_v52, %v2310_v23 }
 0x2a0   : > { %v770_v19 = vmul.f32 %v1343_v6, %v769_v17  ;;  %v776_v20 = vmul.f32 %v1345_v18, %v762_v7  ;;  %vm782_vm3 = vweird.f32 %v1345_v18 }
 0x2a1   : > { %vm783_vm5 = vmor %vm781_vm4, %vm782_vm3 }
 0x2a2   : > { %v774_v24 = vsel %vm773_vm2, %v1343_v6, %v770_v19  ;;  %v777_v25 = vmul.f32 %v1345_v18, %v776_v20 }
 0x2a3   : > { %v805_v27 = vmul.f32 %v774_v24, %v757_v21 }
 0x2a4   : > { %v778_v28 = vmul.f32 0.5, %v777_v25  ;;  %v739_v29 = vpop.xlane.xlu1 %738 }
 0x2a5   : > { %v1347_v30 = vpop.eup %1346  ;;  %v813_v32 = vmul.f32 %v2308_v22, %v805_v27  ;;  %v748_v34 = vmul.f32 %v740_v54, %v739_v29 }
 0x2a6   : > { %v779_v36 = vsub.f32 1.5, %v778_v28  ;;  %v786_v37 = vmul.f32 %v1347_v30, %v763_v16  ;;  %vm792_vm6 = vweird.f32 %v1347_v30 }
 0x2a7   : > { %v821_v38 = vadd.f32 %v2313_v26, %v813_v32  ;;  %v756_v39 = vsub.f32 %v748_v34, %v752_v33  ;;  %vm793_vm8 = vmor %vm791_vm7, %vm792_vm6 }
 0x2a8   : > { %v780_v41 = vmul.f32 %v1345_v18, %v779_v36  ;;  %v787_v42 = vmul.f32 %v1347_v30, %v786_v37 }
 0x2a9   : > { %v826_v45 = vmul.f32 %v825_v35, %v821_v38  ;;  %v764_v47 = vadd.f32 1e-05, %v756_v39 }
 0x2aa   : > { %v784_v49 = vsel %vm783_vm5, %v1345_v18, %v780_v41  ;;  %v788_v50 = vmul.f32 0.5, %v787_v42 }
 0x2ab   : > { %v836_v51 = vadd.f32 %v832_v43, %v826_v45  ;;  %v806_v53 = vmul.f32 %v784_v49, %v758_v46  ;;  %1348 = vrsqrt.f32 %v764_v47  ;;  %vm801_vm10 = vweird.f32 %v764_v47 }
 0x2ac   : > { %v789_v54 = vsub.f32 1.5, %v788_v50 }
 0x2ad   : > { %840 = vst [vmem:[%s2327_s14] sm:$0xff] %v836_v51  ;;  %v814_v40 = vmul.f32 %v2308_v22, %v806_v53 }
 0x2ae   : > { %v790_v55 = vmul.f32 %v1347_v30, %v789_v54 }
 0x2af   : > { %v822_v56 = vadd.f32 %v2313_v26, %v814_v40 }
 0x2b0   : > { %v794_v58 = vsel %vm793_vm8, %v1347_v30, %v790_v55 }
 0x2b1   : > { %v1349_v59 = vpop.eup %1348  ;;  %v827_v61 = vmul.f32 %v825_v35, %v822_v56  ;;  %v807_v62 = vmul.f32 %v794_v58, %v759_v57 }
 0x2b2   : > { %v796_v63 = vmul.f32 %v1349_v59, %v764_v47  ;;  %vm802_vm9 = vweird.f32 %v1349_v59 }
 0x2b3   : > { %v837_v0 = vadd.f32 %v833_v60, %v827_v61  ;;  %v815_v1 = vmul.f32 %v2308_v22, %v807_v62  ;;  %vm803_vm11 = vmor %vm801_vm10, %vm802_vm9 }
 0x2b4   : > { %v797_v2 = vmul.f32 %v1349_v59, %v796_v63 }
 0x2b5   : > { %841 = vst [vmem:[%s2327_s14 + $0x8] sm:$0xff] %v837_v0  ;;  %v823_v3 = vadd.f32 %v2313_v26, %v815_v1 }
 0x2b6   : > { %v798_v4 = vmul.f32 0.5, %v797_v2 }
 0x2b7   : > { %v828_v6 = vmul.f32 %v825_v35, %v823_v3 }
 0x2b8   : > { %v799_v7 = vsub.f32 1.5, %v798_v4 }
 0x2b9   : > { %v838_v44 = vadd.f32 %v834_v5, %v828_v6 }
 0x2ba   : > { %v800_v8 = vmul.f32 %v1349_v59, %v799_v7 }
 0x2bb   : > { %842 = vst [vmem:[%s2327_s14 + $0x10] sm:$0xff] %v838_v44 }
 0x2bc   : > { %v804_v10 = vsel %vm803_vm11, %v1349_v59, %v800_v8 }
 0x2bd   : > { %v808_v11 = vmul.f32 %v804_v10, %v760_v9 }
 0x2bf   : > { %v816_v48 = vmul.f32 %v2308_v22, %v808_v11 }
 0x2c1   : > { %v824_v12 = vadd.f32 %v2313_v26, %v816_v48 }
 0x2c3   : > { %v829_v14 = vmul.f32 %v825_v35, %v824_v12 }
 0x2c5   : > { %v839_v15 = vadd.f32 %v835_v13, %v829_v14 }
 0x2c7   : > { %843 = vst [vmem:[%s2327_s14 + $0x18] sm:$0xff] %v839_v15 }
 0x2c8   : > { %1563 = shalt.err (!%p1560_p2)
}
 0x2c9   : > { %s1725_s7 = smov 128   ;;  %s1726_s13 = smov 8  }
 0x2ca   : > { %1169 = dma.vmem_to_hbm [thread:$0]  (%p2538_p3), %s858_s28, 512, %s860_s11, %s845_s18, %s1725_s7, %s1725_s7, %s1726_s13  }
 0x2cb PF: > { %s2539_s30 = sld [smem:[#allocation37_spill]]  ;;  %p1200_p8 = scmp.ge.s32.totalorder %s1716_s17, 2 }
 0x2cc   : > { %s2540_s16 = sld [smem:[#allocation40_spill]] }
 0x2d1   : > { %s874_s14 = sand.u32 1, %s2539_s30  }
 0x2d2   : > { %p2541_p1 = scmp.ne.s32.totalorder %s2540_s16, 0  ;;  %s875_s27 = scalar_lea.sflag [#allocation8], %s874_s14 }
 0x2d4   : > { %p1196_p11 = pnand %p1200_p8, %p2541_p1 }
 0x2d6   : > { %p1197_p7 = pneg %p1196_p11 }
 0x2d8   : > { %1651 = dma.done.wait (%p1197_p7), %s875_s27, 512  }
 0x2d9   : > { %1653 = vsyncadd (%p1197_p7), %s875_s27, 4294966784  ;;  %s2542_s2 = sld [smem:[#allocation32_spill]]  ;;  %p47_p6 = scmp.ge.s32.totalorder %s1873_s19, 5  }
 0x2da   : > { %s2543_s22 = sld [smem:[#allocation33_spill]]  ;;  %s2552_s0 = smov %s1660_s1 }
 0x2db   : > { %s2544_s27 = sld [smem:[#allocation43_spill]]  ;;  %s2554_s25 = smov %s2575_s8 }
 0x2dc   : > { %s2545_s5 = sld [smem:[#allocation34_spill]]  ;;  %s2557_s28 = smov %s1684_s29 }
 0x2dd   : > { %s2546_s30 = sld [smem:[#allocation45_spill]]  ;;  %s2559_s14 = smov %s1708_s15 }
 0x2de   : > { %s2547_s11 = sld [smem:[#allocation35_spill]] }
 0x2df   : > { %s2548_s12 = sld [smem:[#allocation36_spill]]  ;;  %s2553_s1 = smov %s2542_s2 }
 0x2e0   : > { %s2549_s13 = sld [smem:[#allocation41_spill]]  ;;  %s2555_s2 = smov %s1672_s26 }
 0x2e1   : > { %s2550_s17 = sld [smem:[#allocation38_spill]]  ;;  %s2556_s26 = smov %s2543_s22 }
 0x2e2   : > { %s2551_s16 = sld [smem:[#allocation44_spill]]  ;;  %s2558_s29 = smov %s2545_s5 }
 0x2e3   :  { %49 = sbr.rel (!%p47_p6) target bundleno = 30 (0x1e), region = 147 }
 0x2e7   : > { %s2560_s15 = smov %s2550_s17  ;;  %s2561_s17 = smov %s1873_s19 }
 0x2e8   :  { %881 = vsyncpa [#allocation7], 1 }
 0x2e9   :  { %883 = vsyncpa [#allocation7 + $0x1], 1 }
 0x2ea   :  { %884 = vsyncpa [#allocation10], 1 }
 0x2eb   :  { %886 = vsyncpa [#allocation10 + $0x1], 1 }
 0x2ec   :  { %887 = vsyncpa [#allocation13], 1 }
 0x2ed   :  { %889 = vsyncpa [#allocation13 + $0x1], 1 }
 0x2ee   :  { %890 = vsyncpa [#allocation8], 1 }
 0x2ef   :  { %892 = vsyncpa [#allocation8 + $0x1], 1 }

</bundles_post_ra>
